<compile_context>
chip_gen: v7x
topology: tpu7x:2x2x1
jax: 0.10.0
libtpu: 0.0.40
codegen_flags: <defaults>
</compile_context>

<pallas_src>
from math import pi, cos
import functools

import jax
import jax.numpy as jnp
from jax import lax
from jax.experimental import pallas as pl
from jax.experimental.pallas import tpu as pltpu

BN_EPS = 1e-5      # nn.BatchNorm1d default eps
NORM_EPS = 1e-12   # F.normalize default eps


# ----------------------------- fused Pallas kernel -----------------------------

def byol_fused_kernel(x_ref, wbb_ref, w1_ref, w2_ref, vecs_ref, loss_ref,
                      *, B, DIM_IN, HID, OUT):
    """Single-call BYOL forward.

    x_ref    : (2B, D_FLAT)          bf16   [x1 ; x2] stacked on the batch axis
    wbb_ref  : (D_FLAT, 2*DIM_IN)    bf16   [online backbone W | target backbone W]
    w1_ref   : (2*DIM_IN + OUT, HID) bf16   rows: [online proj W1 ; target proj W1 ; predictor W1]
    w2_ref   : (HID, 3*OUT)          bf16   cols: [online proj W2 | target proj W2 | predictor W2]
    vecs_ref : (13, VEC_W)           f32    bias / gamma / beta rows (see layout below)
    loss_ref : (1, 1)                f32
    """
    two_b = 2 * B
    x = x_ref[...]

    # vector-slab row layout (each row sliced back to its true width):
    #   0         : packed backbone bias [online | target]      width 2*DIM_IN
    #   1,2,3     : online projector  b1, gamma, beta           width HID
    #   4         : online projector  b2                        width OUT
    #   5,6,7     : target projector  b1, gamma, beta           width HID
    #   8         : target projector  b2                        width OUT
    #   9,10,11   : predictor         b1, gamma, beta           width HID
    #   12        : predictor         b2                        width OUT
    def vrow(i, w):
        return vecs_ref[i:i + 1, :w]

    bbb = vrow(0, 2 * DIM_IN)
    ob1, og, obeta, ob2 = vrow(1, HID), vrow(2, HID), vrow(3, HID), vrow(4, OUT)
    tb1, tg, tbeta, tb2 = vrow(5, HID), vrow(6, HID), vrow(7, HID), vrow(8, OUT)
    pb1, pg, pbeta, pb2 = vrow(9, HID), vrow(10, HID), vrow(11, HID), vrow(12, OUT)

    # packed weight slabs -> per-branch views (static slices, no data movement cost at trace time)
    ow1 = w1_ref[0:DIM_IN, :]
    tw1 = w1_ref[DIM_IN:2 * DIM_IN, :]
    pw1 = w1_ref[2 * DIM_IN:2 * DIM_IN + OUT, :]
    ow2 = w2_ref[:, 0:OUT]
    tw2 = w2_ref[:, OUT:2 * OUT]
    pw2 = w2_ref[:, 2 * OUT:3 * OUT]

    # fused online+target backbone: one MXU contraction over K = D_FLAT, f32 accumulation
    feat = jnp.dot(x, wbb_ref[...], preferred_element_type=jnp.float32) + bbb
    feat_o = feat[:, :DIM_IN]
    feat_t = feat[:, DIM_IN:]

    def bn_relu_half(a, g, beta):
        # BatchNorm1d, training-mode batch stats (biased variance) over one view's B rows.
        mean = jnp.mean(a, axis=0, keepdims=True)
        d = a - mean
        var = jnp.mean(d * d, axis=0, keepdims=True)
        return jnp.maximum(d * lax.rsqrt(var + BN_EPS) * g + beta, 0.0)

    def bn_relu(a, g, beta):
        # per-view statistics via static, sublane-aligned half slices (B is a multiple of 8)
        return jnp.concatenate(
            [bn_relu_half(a[:B], g, beta), bn_relu_half(a[B:], g, beta)], axis=0)

    def mlp(h, w1, b1, g, beta, w2, b2):
        a = jnp.dot(h.astype(w1.dtype), w1, preferred_element_type=jnp.float32) + b1
        a = bn_relu(a, g, beta)
        return jnp.dot(a.astype(w2.dtype), w2, preferred_element_type=jnp.float32) + b2

    # online branch: backbone -> projector -> predictor (both views at once)
    z_o = mlp(feat_o, ow1, ob1, og, obeta, ow2, ob2)
    p_o = mlp(z_o, pw1, pb1, pg, pbeta, pw2, pb2)          # [p1 ; p2]
    # target branch (EMA weights; forward-only == torch.no_grad semantics)
    z_t = mlp(feat_t, tw1, tb1, tg, tbeta, tw2, tb2)       # [z1_t ; z2_t]

    def l2_normalize(v):
        # F.normalize: v / max(||v||, eps) == v * rsqrt(max(||v||^2, eps^2))
        ss = jnp.sum(v * v, axis=1, keepdims=True)
        return v * lax.rsqrt(jnp.maximum(ss, NORM_EPS * NORM_EPS))

    pn = l2_normalize(p_o)
    zn = l2_normalize(z_t)

    # L = D(p1, z2_t)/2 + D(p2, z1_t)/2 = -(1/2B) * sum_i (p1_i . z2_i  +  p2_i . z1_i)
    cross = pn[:B] * zn[B:] + pn[B:] * zn[:B]              # (B, OUT), pure VPU (no MXU matmul)
    s = jnp.sum(cross, axis=1, keepdims=True)              # (B, 1)
    loss_ref[...] = -jnp.sum(s, axis=0, keepdims=True) * (1.0 / two_b)   # (1, 1)


# ----------------------------- wrapper -----------------------------

def byol_fused_call(x_flat, online_enc, predictor, target_enc):
    (owbb, obbb), (ow1, ob1, og, obeta, ow2, ob2) = online_enc
    (twbb, tbbb), (tw1, tb1, tg, tbeta, tw2, tb2) = target_enc
    (pw1, pb1, pg, pbeta, pw2, pb2) = predictor

    B = x_flat.shape[0] // 2
    two_b = 2 * B
    D_FLAT, DIM_IN = owbb.shape
    HID = ow1.shape[1]
    OUT = ow2.shape[1]

    # MXU operands in bf16 (halves HBM->VMEM DMA bytes; accumulation stays f32 in-kernel)
    mxu_dt = jnp.bfloat16
    x_mxu = x_flat.astype(mxu_dt)
    wbb = jnp.concatenate([owbb, twbb], axis=1).astype(mxu_dt)       # (D_FLAT, 2*DIM_IN)
    w1 = jnp.concatenate([ow1, tw1, pw1], axis=0).astype(mxu_dt)     # (2*DIM_IN + OUT, HID)
    w2 = jnp.concatenate([ow2, tw2, pw2], axis=1).astype(mxu_dt)     # (HID, 3*OUT)

    # one f32 slab holding every (1, X) bias / gamma / beta row (keeps elementwise math in f32)
    VEC_W = max(2 * DIM_IN, HID, OUT)

    def pad(v):
        return jnp.pad(v, ((0, 0), (0, VEC_W - v.shape[1])))

    vecs = jnp.concatenate([
        pad(jnp.concatenate([obbb, tbbb], axis=1)),
        pad(ob1), pad(og), pad(obeta), pad(ob2),
        pad(tb1), pad(tg), pad(tbeta), pad(tb2),
        pad(pb1), pad(pg), pad(pbeta), pad(pb2),
    ], axis=0).astype(jnp.float32)                                    # (13, VEC_W)

    args = (x_mxu, wbb, w1, w2, vecs)

    def mm_flops(m, k, n):
        return 2 * m * k * n

    flops = (mm_flops(two_b, D_FLAT, 2 * DIM_IN)        # fused online+target backbone
             + 2 * mm_flops(two_b, DIM_IN, HID)         # online + target projector layer 1
             + 2 * mm_flops(two_b, HID, OUT)            # online + target projector layer 2
             + mm_flops(two_b, OUT, HID)                # predictor layer 1
             + mm_flops(two_b, HID, OUT))               # predictor layer 2
    bytes_accessed = sum(int(a.size) * int(a.dtype.itemsize) for a in args) + 4
    cost = pl.CostEstimate(flops=int(flops),
                           transcendentals=int(6 * HID + 2 * two_b),
                           bytes_accessed=int(bytes_accessed))

    vmem_spec = pl.BlockSpec(memory_space=pltpu.MemorySpace.VMEM)
    loss = pl.pallas_call(
        functools.partial(byol_fused_kernel, B=B, DIM_IN=DIM_IN, HID=HID, OUT=OUT),
        out_shape=jax.ShapeDtypeStruct((1, 1), jnp.float32),
        in_specs=[vmem_spec] * len(args),
        out_specs=vmem_spec,
        cost_estimate=cost,
    )(*args)
    return loss[0, 0]


# ----------------------------- parameter setup (deterministic) -----------------------------

def init_linear(key, din, dout, scale=0.05):
    kw, kb = jax.random.split(key)
    w = scale * jax.random.normal(kw, (din, dout), jnp.float32)
    b = scale * jax.random.normal(kb, (1, dout), jnp.float32)
    return w, b


def init_mlp(key, din, dhid, dout):
    k1, k2 = jax.random.split(key)
    w1, b1 = init_linear(k1, din, dhid)
    g = jnp.ones((1, dhid), jnp.float32)      # nn.init.constant_(bn.weight, 1.0)
    beta = jnp.zeros((1, dhid), jnp.float32)  # nn.init.constant_(bn.bias, 0.0)
    w2, b2 = init_linear(k2, dhid, dout)
    return (w1, b1, g, beta, w2, b2)


# ----------------------------- BYOL forward -----------------------------

def target_ema(k, K, base_ema=0.004):
    return 1.0 - base_ema * (cos(pi * k / K) + 1.0) / 2.0


def byol_forward(x, online_enc, predictor, target_enc, progress=None):
    x1, x2 = x[0], x[1]
    B = x1.shape[0]
    # flatten NCHW row-major (== torch.flatten) and stack the two views on the batch axis
    x_flat = jnp.concatenate([x1.reshape(B, -1), x2.reshape(B, -1)], axis=0)   # (2B, C*H*W)

    # EMA update of target params inside forward, as in the PyTorch module.
    # stop_gradient mirrors torch.no_grad(): no gradient leaks through the returned target params.
    if progress is not None and len(progress) == 2:
        k, K = progress
    else:
        k, K = 0, 1
    tau = target_ema(k, K)
    target_enc = jax.tree_util.tree_map(
        lambda o, t: tau * lax.stop_gradient(t) + (1.0 - tau) * lax.stop_gradient(o),
        online_enc, target_enc)

    loss = byol_fused_call(x_flat, online_enc, predictor, target_enc)
    return loss, target_enc


# ----------------------------- main -----------------------------

if __name__ == "__main__":
    # small shapes: 2 views, batch 8 (multiple of 8 -> aligned per-view BN slices),
    # channels 4, 8x8 spatial; DIM_IN = 32
    B, C, H, W = 8, 4, 8, 8
    DIM_IN = 32
    D_FLAT = C * H * W

    key = jax.random.PRNGKey(0)
    kx, kbb, kproj, kpred = jax.random.split(key, 4)

    x = jax.random.normal(kx, (2, B, C, H, W), jnp.float32)

    # online encoder = backbone Linear(D_FLAT, DIM_IN) + projector MLP(DIM_IN, 2*DIM_IN, DIM_IN//2)
    backbone = init_linear(kbb, D_FLAT, DIM_IN)
    projector = init_mlp(kproj, DIM_IN, DIM_IN * 2, DIM_IN // 2)
    online_enc = (backbone, projector)

    # target encoder = deepcopy of online encoder
    target_enc = jax.tree_util.tree_map(lambda a: a, online_enc)

    # online predictor = MLP(DIM_IN//2, 2*DIM_IN, DIM_IN//2)
    predictor = init_mlp(kpred, DIM_IN // 2, DIM_IN * 2, DIM_IN // 2)

    loss, target_enc = byol_forward(x, online_enc, predictor, target_enc, progress=None)
    jax.block_until_ready(loss)
    print("KERNEL_OK")
</pallas_src>

<mosaic_0001>
module attributes {stable_mosaic.version = 11 : i64} {
  func.func @byol_fused_kernel(%arg0: memref<16x256xbf16, #tpu.memory_space<vmem>>, %arg1: memref<256x64xbf16, #tpu.memory_space<vmem>>, %arg2: memref<80x64xbf16, #tpu.memory_space<vmem>>, %arg3: memref<64x48xbf16, #tpu.memory_space<vmem>>, %arg4: memref<13x64xf32, #tpu.memory_space<vmem>>, %arg5: memref<1x1xf32, #tpu.memory_space<vmem>>) attributes {dimension_semantics = [], scalar_prefetch = 0 : i64, scratch_operands = 0 : i64, tpu.core_type = #tpu.core_type<tc>} {
    %c0 = arith.constant 0 : index
    %c0_0 = arith.constant 0 : index
    %0 = vector.load %arg0[%c0, %c0_0] : memref<16x256xbf16, #tpu.memory_space<vmem>>, vector<16x256xbf16>
    %c0_1 = arith.constant 0 : index
    %c0_2 = arith.constant 0 : index
    %1 = vector.load %arg4[%c0_1, %c0_2] : memref<13x64xf32, #tpu.memory_space<vmem>>, vector<1x64xf32>
    %c1 = arith.constant 1 : index
    %c0_3 = arith.constant 0 : index
    %2 = vector.load %arg4[%c1, %c0_3] : memref<13x64xf32, #tpu.memory_space<vmem>>, vector<1x64xf32>
    %c2 = arith.constant 2 : index
    %c0_4 = arith.constant 0 : index
    %3 = vector.load %arg4[%c2, %c0_4] : memref<13x64xf32, #tpu.memory_space<vmem>>, vector<1x64xf32>
    %c3 = arith.constant 3 : index
    %c0_5 = arith.constant 0 : index
    %4 = vector.load %arg4[%c3, %c0_5] : memref<13x64xf32, #tpu.memory_space<vmem>>, vector<1x64xf32>
    %c4 = arith.constant 4 : index
    %c0_6 = arith.constant 0 : index
    %5 = vector.load %arg4[%c4, %c0_6] : memref<13x64xf32, #tpu.memory_space<vmem>>, vector<1x16xf32>
    %c5 = arith.constant 5 : index
    %c0_7 = arith.constant 0 : index
    %6 = vector.load %arg4[%c5, %c0_7] : memref<13x64xf32, #tpu.memory_space<vmem>>, vector<1x64xf32>
    %c6 = arith.constant 6 : index
    %c0_8 = arith.constant 0 : index
    %7 = vector.load %arg4[%c6, %c0_8] : memref<13x64xf32, #tpu.memory_space<vmem>>, vector<1x64xf32>
    %c7 = arith.constant 7 : index
    %c0_9 = arith.constant 0 : index
    %8 = vector.load %arg4[%c7, %c0_9] : memref<13x64xf32, #tpu.memory_space<vmem>>, vector<1x64xf32>
    %c8 = arith.constant 8 : index
    %c0_10 = arith.constant 0 : index
    %9 = vector.load %arg4[%c8, %c0_10] : memref<13x64xf32, #tpu.memory_space<vmem>>, vector<1x16xf32>
    %c9 = arith.constant 9 : index
    %c0_11 = arith.constant 0 : index
    %10 = vector.load %arg4[%c9, %c0_11] : memref<13x64xf32, #tpu.memory_space<vmem>>, vector<1x64xf32>
    %c10 = arith.constant 10 : index
    %c0_12 = arith.constant 0 : index
    %11 = vector.load %arg4[%c10, %c0_12] : memref<13x64xf32, #tpu.memory_space<vmem>>, vector<1x64xf32>
    %c11 = arith.constant 11 : index
    %c0_13 = arith.constant 0 : index
    %12 = vector.load %arg4[%c11, %c0_13] : memref<13x64xf32, #tpu.memory_space<vmem>>, vector<1x64xf32>
    %c12 = arith.constant 12 : index
    %c0_14 = arith.constant 0 : index
    %13 = vector.load %arg4[%c12, %c0_14] : memref<13x64xf32, #tpu.memory_space<vmem>>, vector<1x16xf32>
    %c0_15 = arith.constant 0 : index
    %c0_16 = arith.constant 0 : index
    %14 = vector.load %arg2[%c0_15, %c0_16] : memref<80x64xbf16, #tpu.memory_space<vmem>>, vector<32x64xbf16>
    %c32 = arith.constant 32 : index
    %c0_17 = arith.constant 0 : index
    %15 = vector.load %arg2[%c32, %c0_17] : memref<80x64xbf16, #tpu.memory_space<vmem>>, vector<32x64xbf16>
    %c64 = arith.constant 64 : index
    %c0_18 = arith.constant 0 : index
    %16 = vector.load %arg2[%c64, %c0_18] : memref<80x64xbf16, #tpu.memory_space<vmem>>, vector<16x64xbf16>
    %c0_19 = arith.constant 0 : index
    %c0_20 = arith.constant 0 : index
    %17 = vector.load %arg3[%c0_19, %c0_20] : memref<64x48xbf16, #tpu.memory_space<vmem>>, vector<64x16xbf16>
    %c0_21 = arith.constant 0 : index
    %c16 = arith.constant 16 : index
    %18 = vector.load %arg3[%c0_21, %c16] : memref<64x48xbf16, #tpu.memory_space<vmem>>, vector<64x16xbf16>
    %c0_22 = arith.constant 0 : index
    %c32_23 = arith.constant 32 : index
    %19 = vector.load %arg3[%c0_22, %c32_23] : memref<64x48xbf16, #tpu.memory_space<vmem>>, vector<64x16xbf16>
    %c0_24 = arith.constant 0 : index
    %c0_25 = arith.constant 0 : index
    %20 = vector.load %arg1[%c0_24, %c0_25] : memref<256x64xbf16, #tpu.memory_space<vmem>>, vector<256x64xbf16>
    %cst = arith.constant dense<0.000000e+00> : vector<16x64xf32>
    %21 = tpu.matmul %0, %20, %cst {dimension_numbers = #tpu.dot_dimension_numbers<[1], [0], [0], [1], [0, 0, 1, 1], [], []>} : vector<16x256xbf16>, vector<256x64xbf16>, vector<16x64xf32> -> vector<16x64xf32>
    %22 = vector.broadcast %1 : vector<1x64xf32> to vector<16x64xf32>
    %23 = arith.addf %21, %22 : vector<16x64xf32>
    %24 = vector.extract_strided_slice %23 {offsets = [0, 0], sizes = [16, 32], strides = [1, 1]} : vector<16x64xf32> to vector<16x32xf32>
    %25 = vector.extract_strided_slice %23 {offsets = [0, 32], sizes = [16, 32], strides = [1, 1]} : vector<16x64xf32> to vector<16x32xf32>
    %26 = arith.truncf %24 : vector<16x32xf32> to vector<16x32xbf16>
    %cst_26 = arith.constant dense<0.000000e+00> : vector<16x64xf32>
    %27 = tpu.matmul %26, %14, %cst_26 {dimension_numbers = #tpu.dot_dimension_numbers<[1], [0], [0], [1], [0, 0, 1, 1], [], []>} : vector<16x32xbf16>, vector<32x64xbf16>, vector<16x64xf32> -> vector<16x64xf32>
    %28 = vector.broadcast %2 : vector<1x64xf32> to vector<16x64xf32>
    %29 = arith.addf %27, %28 : vector<16x64xf32>
    %30 = vector.extract_strided_slice %29 {offsets = [0, 0], sizes = [8, 64], strides = [1, 1]} : vector<16x64xf32> to vector<8x64xf32>
    %cst_27 = arith.constant dense<0.000000e+00> : vector<64xf32>
    %31 = vector.multi_reduction <add>, %30, %cst_27 [0] : vector<8x64xf32> to vector<64xf32>
    %32 = vector.shape_cast %31 : vector<64xf32> to vector<1x64xf32>
    %cst_28 = arith.constant 8.000000e+00 : f32
    %33 = vector.broadcast %cst_28 : f32 to vector<1x64xf32>
    %34 = arith.divf %32, %33 : vector<1x64xf32>
    %35 = vector.broadcast %34 : vector<1x64xf32> to vector<8x64xf32>
    %36 = arith.subf %30, %35 : vector<8x64xf32>
    %37 = arith.mulf %36, %36 : vector<8x64xf32>
    %cst_29 = arith.constant dense<0.000000e+00> : vector<64xf32>
    %38 = vector.multi_reduction <add>, %37, %cst_29 [0] : vector<8x64xf32> to vector<64xf32>
    %39 = vector.shape_cast %38 : vector<64xf32> to vector<1x64xf32>
    %cst_30 = arith.constant 8.000000e+00 : f32
    %40 = vector.broadcast %cst_30 : f32 to vector<1x64xf32>
    %41 = arith.divf %39, %40 : vector<1x64xf32>
    %cst_31 = arith.constant 9.99999974E-6 : f32
    %42 = vector.broadcast %cst_31 : f32 to vector<1x64xf32>
    %43 = arith.addf %41, %42 : vector<1x64xf32>
    %44 = math.rsqrt %43 : vector<1x64xf32>
    %45 = vector.broadcast %44 : vector<1x64xf32> to vector<8x64xf32>
    %46 = arith.mulf %36, %45 : vector<8x64xf32>
    %47 = vector.broadcast %3 : vector<1x64xf32> to vector<8x64xf32>
    %48 = arith.mulf %46, %47 : vector<8x64xf32>
    %49 = vector.broadcast %4 : vector<1x64xf32> to vector<8x64xf32>
    %50 = arith.addf %48, %49 : vector<8x64xf32>
    %cst_32 = arith.constant 0.000000e+00 : f32
    %51 = vector.broadcast %cst_32 : f32 to vector<8x64xf32>
    %52 = arith.maximumf %50, %51 : vector<8x64xf32>
    %53 = vector.extract_strided_slice %29 {offsets = [8, 0], sizes = [8, 64], strides = [1, 1]} : vector<16x64xf32> to vector<8x64xf32>
    %cst_33 = arith.constant dense<0.000000e+00> : vector<64xf32>
    %54 = vector.multi_reduction <add>, %53, %cst_33 [0] : vector<8x64xf32> to vector<64xf32>
    %55 = vector.shape_cast %54 : vector<64xf32> to vector<1x64xf32>
    %cst_34 = arith.constant 8.000000e+00 : f32
    %56 = vector.broadcast %cst_34 : f32 to vector<1x64xf32>
    %57 = arith.divf %55, %56 : vector<1x64xf32>
    %58 = vector.broadcast %57 : vector<1x64xf32> to vector<8x64xf32>
    %59 = arith.subf %53, %58 : vector<8x64xf32>
    %60 = arith.mulf %59, %59 : vector<8x64xf32>
    %cst_35 = arith.constant dense<0.000000e+00> : vector<64xf32>
    %61 = vector.multi_reduction <add>, %60, %cst_35 [0] : vector<8x64xf32> to vector<64xf32>
    %62 = vector.shape_cast %61 : vector<64xf32> to vector<1x64xf32>
    %cst_36 = arith.constant 8.000000e+00 : f32
    %63 = vector.broadcast %cst_36 : f32 to vector<1x64xf32>
    %64 = arith.divf %62, %63 : vector<1x64xf32>
    %cst_37 = arith.constant 9.99999974E-6 : f32
    %65 = vector.broadcast %cst_37 : f32 to vector<1x64xf32>
    %66 = arith.addf %64, %65 : vector<1x64xf32>
    %67 = math.rsqrt %66 : vector<1x64xf32>
    %68 = vector.broadcast %67 : vector<1x64xf32> to vector<8x64xf32>
    %69 = arith.mulf %59, %68 : vector<8x64xf32>
    %70 = vector.broadcast %3 : vector<1x64xf32> to vector<8x64xf32>
    %71 = arith.mulf %69, %70 : vector<8x64xf32>
    %72 = vector.broadcast %4 : vector<1x64xf32> to vector<8x64xf32>
    %73 = arith.addf %71, %72 : vector<8x64xf32>
    %cst_38 = arith.constant 0.000000e+00 : f32
    %74 = vector.broadcast %cst_38 : f32 to vector<8x64xf32>
    %75 = arith.maximumf %73, %74 : vector<8x64xf32>
    %76 = tpu.concatenate %52, %75 in 0 : vector<8x64xf32>, vector<8x64xf32> -> vector<16x64xf32>
    %77 = arith.truncf %76 : vector<16x64xf32> to vector<16x64xbf16>
    %cst_39 = arith.constant dense<0.000000e+00> : vector<16x16xf32>
    %78 = tpu.matmul %77, %17, %cst_39 {dimension_numbers = #tpu.dot_dimension_numbers<[1], [0], [0], [1], [0, 0, 1, 1], [], []>} : vector<16x64xbf16>, vector<64x16xbf16>, vector<16x16xf32> -> vector<16x16xf32>
    %79 = vector.broadcast %5 : vector<1x16xf32> to vector<16x16xf32>
    %80 = arith.addf %78, %79 : vector<16x16xf32>
    %81 = arith.truncf %80 : vector<16x16xf32> to vector<16x16xbf16>
    %cst_40 = arith.constant dense<0.000000e+00> : vector<16x64xf32>
    %82 = tpu.matmul %81, %16, %cst_40 {dimension_numbers = #tpu.dot_dimension_numbers<[1], [0], [0], [1], [0, 0, 1, 1], [], []>} : vector<16x16xbf16>, vector<16x64xbf16>, vector<16x64xf32> -> vector<16x64xf32>
    %83 = vector.broadcast %10 : vector<1x64xf32> to vector<16x64xf32>
    %84 = arith.addf %82, %83 : vector<16x64xf32>
    %85 = vector.extract_strided_slice %84 {offsets = [0, 0], sizes = [8, 64], strides = [1, 1]} : vector<16x64xf32> to vector<8x64xf32>
    %cst_41 = arith.constant dense<0.000000e+00> : vector<64xf32>
    %86 = vector.multi_reduction <add>, %85, %cst_41 [0] : vector<8x64xf32> to vector<64xf32>
    %87 = vector.shape_cast %86 : vector<64xf32> to vector<1x64xf32>
    %cst_42 = arith.constant 8.000000e+00 : f32
    %88 = vector.broadcast %cst_42 : f32 to vector<1x64xf32>
    %89 = arith.divf %87, %88 : vector<1x64xf32>
    %90 = vector.broadcast %89 : vector<1x64xf32> to vector<8x64xf32>
    %91 = arith.subf %85, %90 : vector<8x64xf32>
    %92 = arith.mulf %91, %91 : vector<8x64xf32>
    %cst_43 = arith.constant dense<0.000000e+00> : vector<64xf32>
    %93 = vector.multi_reduction <add>, %92, %cst_43 [0] : vector<8x64xf32> to vector<64xf32>
    %94 = vector.shape_cast %93 : vector<64xf32> to vector<1x64xf32>
    %cst_44 = arith.constant 8.000000e+00 : f32
    %95 = vector.broadcast %cst_44 : f32 to vector<1x64xf32>
    %96 = arith.divf %94, %95 : vector<1x64xf32>
    %cst_45 = arith.constant 9.99999974E-6 : f32
    %97 = vector.broadcast %cst_45 : f32 to vector<1x64xf32>
    %98 = arith.addf %96, %97 : vector<1x64xf32>
    %99 = math.rsqrt %98 : vector<1x64xf32>
    %100 = vector.broadcast %99 : vector<1x64xf32> to vector<8x64xf32>
    %101 = arith.mulf %91, %100 : vector<8x64xf32>
    %102 = vector.broadcast %11 : vector<1x64xf32> to vector<8x64xf32>
    %103 = arith.mulf %101, %102 : vector<8x64xf32>
    %104 = vector.broadcast %12 : vector<1x64xf32> to vector<8x64xf32>
    %105 = arith.addf %103, %104 : vector<8x64xf32>
    %cst_46 = arith.constant 0.000000e+00 : f32
    %106 = vector.broadcast %cst_46 : f32 to vector<8x64xf32>
    %107 = arith.maximumf %105, %106 : vector<8x64xf32>
    %108 = vector.extract_strided_slice %84 {offsets = [8, 0], sizes = [8, 64], strides = [1, 1]} : vector<16x64xf32> to vector<8x64xf32>
    %cst_47 = arith.constant dense<0.000000e+00> : vector<64xf32>
    %109 = vector.multi_reduction <add>, %108, %cst_47 [0] : vector<8x64xf32> to vector<64xf32>
    %110 = vector.shape_cast %109 : vector<64xf32> to vector<1x64xf32>
    %cst_48 = arith.constant 8.000000e+00 : f32
    %111 = vector.broadcast %cst_48 : f32 to vector<1x64xf32>
    %112 = arith.divf %110, %111 : vector<1x64xf32>
    %113 = vector.broadcast %112 : vector<1x64xf32> to vector<8x64xf32>
    %114 = arith.subf %108, %113 : vector<8x64xf32>
    %115 = arith.mulf %114, %114 : vector<8x64xf32>
    %cst_49 = arith.constant dense<0.000000e+00> : vector<64xf32>
    %116 = vector.multi_reduction <add>, %115, %cst_49 [0] : vector<8x64xf32> to vector<64xf32>
    %117 = vector.shape_cast %116 : vector<64xf32> to vector<1x64xf32>
    %cst_50 = arith.constant 8.000000e+00 : f32
    %118 = vector.broadcast %cst_50 : f32 to vector<1x64xf32>
    %119 = arith.divf %117, %118 : vector<1x64xf32>
    %cst_51 = arith.constant 9.99999974E-6 : f32
    %120 = vector.broadcast %cst_51 : f32 to vector<1x64xf32>
    %121 = arith.addf %119, %120 : vector<1x64xf32>
    %122 = math.rsqrt %121 : vector<1x64xf32>
    %123 = vector.broadcast %122 : vector<1x64xf32> to vector<8x64xf32>
    %124 = arith.mulf %114, %123 : vector<8x64xf32>
    %125 = vector.broadcast %11 : vector<1x64xf32> to vector<8x64xf32>
    %126 = arith.mulf %124, %125 : vector<8x64xf32>
    %127 = vector.broadcast %12 : vector<1x64xf32> to vector<8x64xf32>
    %128 = arith.addf %126, %127 : vector<8x64xf32>
    %cst_52 = arith.constant 0.000000e+00 : f32
    %129 = vector.broadcast %cst_52 : f32 to vector<8x64xf32>
    %130 = arith.maximumf %128, %129 : vector<8x64xf32>
    %131 = tpu.concatenate %107, %130 in 0 : vector<8x64xf32>, vector<8x64xf32> -> vector<16x64xf32>
    %132 = arith.truncf %131 : vector<16x64xf32> to vector<16x64xbf16>
    %cst_53 = arith.constant dense<0.000000e+00> : vector<16x16xf32>
    %133 = tpu.matmul %132, %19, %cst_53 {dimension_numbers = #tpu.dot_dimension_numbers<[1], [0], [0], [1], [0, 0, 1, 1], [], []>} : vector<16x64xbf16>, vector<64x16xbf16>, vector<16x16xf32> -> vector<16x16xf32>
    %134 = vector.broadcast %13 : vector<1x16xf32> to vector<16x16xf32>
    %135 = arith.addf %133, %134 : vector<16x16xf32>
    %136 = arith.truncf %25 : vector<16x32xf32> to vector<16x32xbf16>
    %cst_54 = arith.constant dense<0.000000e+00> : vector<16x64xf32>
    %137 = tpu.matmul %136, %15, %cst_54 {dimension_numbers = #tpu.dot_dimension_numbers<[1], [0], [0], [1], [0, 0, 1, 1], [], []>} : vector<16x32xbf16>, vector<32x64xbf16>, vector<16x64xf32> -> vector<16x64xf32>
    %138 = vector.broadcast %6 : vector<1x64xf32> to vector<16x64xf32>
    %139 = arith.addf %137, %138 : vector<16x64xf32>
    %140 = vector.extract_strided_slice %139 {offsets = [0, 0], sizes = [8, 64], strides = [1, 1]} : vector<16x64xf32> to vector<8x64xf32>
    %cst_55 = arith.constant dense<0.000000e+00> : vector<64xf32>
    %141 = vector.multi_reduction <add>, %140, %cst_55 [0] : vector<8x64xf32> to vector<64xf32>
    %142 = vector.shape_cast %141 : vector<64xf32> to vector<1x64xf32>
    %cst_56 = arith.constant 8.000000e+00 : f32
    %143 = vector.broadcast %cst_56 : f32 to vector<1x64xf32>
    %144 = arith.divf %142, %143 : vector<1x64xf32>
    %145 = vector.broadcast %144 : vector<1x64xf32> to vector<8x64xf32>
    %146 = arith.subf %140, %145 : vector<8x64xf32>
    %147 = arith.mulf %146, %146 : vector<8x64xf32>
    %cst_57 = arith.constant dense<0.000000e+00> : vector<64xf32>
    %148 = vector.multi_reduction <add>, %147, %cst_57 [0] : vector<8x64xf32> to vector<64xf32>
    %149 = vector.shape_cast %148 : vector<64xf32> to vector<1x64xf32>
    %cst_58 = arith.constant 8.000000e+00 : f32
    %150 = vector.broadcast %cst_58 : f32 to vector<1x64xf32>
    %151 = arith.divf %149, %150 : vector<1x64xf32>
    %cst_59 = arith.constant 9.99999974E-6 : f32
    %152 = vector.broadcast %cst_59 : f32 to vector<1x64xf32>
    %153 = arith.addf %151, %152 : vector<1x64xf32>
    %154 = math.rsqrt %153 : vector<1x64xf32>
    %155 = vector.broadcast %154 : vector<1x64xf32> to vector<8x64xf32>
    %156 = arith.mulf %146, %155 : vector<8x64xf32>
    %157 = vector.broadcast %7 : vector<1x64xf32> to vector<8x64xf32>
    %158 = arith.mulf %156, %157 : vector<8x64xf32>
    %159 = vector.broadcast %8 : vector<1x64xf32> to vector<8x64xf32>
    %160 = arith.addf %158, %159 : vector<8x64xf32>
    %cst_60 = arith.constant 0.000000e+00 : f32
    %161 = vector.broadcast %cst_60 : f32 to vector<8x64xf32>
    %162 = arith.maximumf %160, %161 : vector<8x64xf32>
    %163 = vector.extract_strided_slice %139 {offsets = [8, 0], sizes = [8, 64], strides = [1, 1]} : vector<16x64xf32> to vector<8x64xf32>
    %cst_61 = arith.constant dense<0.000000e+00> : vector<64xf32>
    %164 = vector.multi_reduction <add>, %163, %cst_61 [0] : vector<8x64xf32> to vector<64xf32>
    %165 = vector.shape_cast %164 : vector<64xf32> to vector<1x64xf32>
    %cst_62 = arith.constant 8.000000e+00 : f32
    %166 = vector.broadcast %cst_62 : f32 to vector<1x64xf32>
    %167 = arith.divf %165, %166 : vector<1x64xf32>
    %168 = vector.broadcast %167 : vector<1x64xf32> to vector<8x64xf32>
    %169 = arith.subf %163, %168 : vector<8x64xf32>
    %170 = arith.mulf %169, %169 : vector<8x64xf32>
    %cst_63 = arith.constant dense<0.000000e+00> : vector<64xf32>
    %171 = vector.multi_reduction <add>, %170, %cst_63 [0] : vector<8x64xf32> to vector<64xf32>
    %172 = vector.shape_cast %171 : vector<64xf32> to vector<1x64xf32>
    %cst_64 = arith.constant 8.000000e+00 : f32
    %173 = vector.broadcast %cst_64 : f32 to vector<1x64xf32>
    %174 = arith.divf %172, %173 : vector<1x64xf32>
    %cst_65 = arith.constant 9.99999974E-6 : f32
    %175 = vector.broadcast %cst_65 : f32 to vector<1x64xf32>
    %176 = arith.addf %174, %175 : vector<1x64xf32>
    %177 = math.rsqrt %176 : vector<1x64xf32>
    %178 = vector.broadcast %177 : vector<1x64xf32> to vector<8x64xf32>
    %179 = arith.mulf %169, %178 : vector<8x64xf32>
    %180 = vector.broadcast %7 : vector<1x64xf32> to vector<8x64xf32>
    %181 = arith.mulf %179, %180 : vector<8x64xf32>
    %182 = vector.broadcast %8 : vector<1x64xf32> to vector<8x64xf32>
    %183 = arith.addf %181, %182 : vector<8x64xf32>
    %cst_66 = arith.constant 0.000000e+00 : f32
    %184 = vector.broadcast %cst_66 : f32 to vector<8x64xf32>
    %185 = arith.maximumf %183, %184 : vector<8x64xf32>
    %186 = tpu.concatenate %162, %185 in 0 : vector<8x64xf32>, vector<8x64xf32> -> vector<16x64xf32>
    %187 = arith.truncf %186 : vector<16x64xf32> to vector<16x64xbf16>
    %cst_67 = arith.constant dense<0.000000e+00> : vector<16x16xf32>
    %188 = tpu.matmul %187, %18, %cst_67 {dimension_numbers = #tpu.dot_dimension_numbers<[1], [0], [0], [1], [0, 0, 1, 1], [], []>} : vector<16x64xbf16>, vector<64x16xbf16>, vector<16x16xf32> -> vector<16x16xf32>
    %189 = vector.broadcast %9 : vector<1x16xf32> to vector<16x16xf32>
    %190 = arith.addf %188, %189 : vector<16x16xf32>
    %191 = arith.mulf %135, %135 : vector<16x16xf32>
    %cst_68 = arith.constant dense<0.000000e+00> : vector<16xf32>
    %192 = vector.multi_reduction <add>, %191, %cst_68 [1] : vector<16x16xf32> to vector<16xf32>
    %193 = vector.shape_cast %192 : vector<16xf32> to vector<16x1xf32>
    %cst_69 = arith.constant 1.000000e-24 : f32
    %194 = vector.broadcast %cst_69 : f32 to vector<16x1xf32>
    %195 = arith.maximumf %193, %194 : vector<16x1xf32>
    %196 = math.rsqrt %195 : vector<16x1xf32>
    %197 = vector.broadcast %196 : vector<16x1xf32> to vector<16x16xf32>
    %198 = arith.mulf %135, %197 : vector<16x16xf32>
    %199 = arith.mulf %190, %190 : vector<16x16xf32>
    %cst_70 = arith.constant dense<0.000000e+00> : vector<16xf32>
    %200 = vector.multi_reduction <add>, %199, %cst_70 [1] : vector<16x16xf32> to vector<16xf32>
    %201 = vector.shape_cast %200 : vector<16xf32> to vector<16x1xf32>
    %cst_71 = arith.constant 1.000000e-24 : f32
    %202 = vector.broadcast %cst_71 : f32 to vector<16x1xf32>
    %203 = arith.maximumf %201, %202 : vector<16x1xf32>
    %204 = math.rsqrt %203 : vector<16x1xf32>
    %205 = vector.broadcast %204 : vector<16x1xf32> to vector<16x16xf32>
    %206 = arith.mulf %190, %205 : vector<16x16xf32>
    %207 = vector.extract_strided_slice %198 {offsets = [0, 0], sizes = [8, 16], strides = [1, 1]} : vector<16x16xf32> to vector<8x16xf32>
    %208 = vector.extract_strided_slice %206 {offsets = [8, 0], sizes = [8, 16], strides = [1, 1]} : vector<16x16xf32> to vector<8x16xf32>
    %209 = arith.mulf %207, %208 : vector<8x16xf32>
    %210 = vector.extract_strided_slice %198 {offsets = [8, 0], sizes = [8, 16], strides = [1, 1]} : vector<16x16xf32> to vector<8x16xf32>
    %211 = vector.extract_strided_slice %206 {offsets = [0, 0], sizes = [8, 16], strides = [1, 1]} : vector<16x16xf32> to vector<8x16xf32>
    %212 = arith.mulf %210, %211 : vector<8x16xf32>
    %213 = arith.addf %209, %212 : vector<8x16xf32>
    %cst_72 = arith.constant dense<0.000000e+00> : vector<8xf32>
    %214 = vector.multi_reduction <add>, %213, %cst_72 [1] : vector<8x16xf32> to vector<8xf32>
    %215 = vector.shape_cast %214 : vector<8xf32> to vector<8x1xf32>
    %cst_73 = arith.constant dense<0.000000e+00> : vector<1xf32>
    %216 = vector.multi_reduction <add>, %215, %cst_73 [0] : vector<8x1xf32> to vector<1xf32>
    %217 = vector.shape_cast %216 : vector<1xf32> to vector<1x1xf32>
    %cst_74 = arith.constant 0.000000e+00 : f32
    %218 = vector.broadcast %cst_74 : f32 to vector<1x1xf32>
    %219 = arith.subf %218, %217 : vector<1x1xf32>
    %cst_75 = arith.constant 6.250000e-02 : f32
    %220 = vector.broadcast %cst_75 : f32 to vector<1x1xf32>
    %221 = arith.mulf %219, %220 : vector<1x1xf32>
    %c0_76 = arith.constant 0 : index
    %c0_77 = arith.constant 0 : index
    %222 = vector.load %arg5[%c0_76, %c0_77] : memref<1x1xf32, #tpu.memory_space<vmem>>, vector<1x1xf32>
    tpu.vector_store %arg5[%c0_76, %c0_77], %221 {strides = array<i32>} : memref<1x1xf32, #tpu.memory_space<vmem>>, vector<1x1xf32>,
    return
  }
}

</mosaic_0001>

<bundles_post_ra>
// kernel: tpu_custom_call.1
= control target key start
LH: loop header
LB: loop body
LE: loop exit
PB: predicated region body
PF: predicated region fallthrough
CT: control target
= control target key end

     0   :  { %s1312_s0 = inlined_call_operand.vmem [shape: bf16[16,256], index: 0, kind: input, shape index: {}]   ;;  %s1313_s1 = inlined_call_operand.vmem [shape: bf16[256,64], index: 1, kind: input, shape index: {}]   ;;  %s1314_s2 = inlined_call_operand.vmem [shape: bf16[80,64], index: 2, kind: input, shape index: {}]   ;;  %s1315_s3 = inlined_call_operand.vmem [shape: bf16[64,48], index: 3, kind: input, shape index: {}]   ;;  %s1316_s4 = inlined_call_operand.vmem [shape: f32[13,64], index: 4, kind: input, shape index: {}]   ;;  %s1317_s5 = inlined_call_operand.hbm [shape: f32[1,1], index: 5, kind: output, shape index: {}]  }
   0x1   :  { %v996_v0 = vld [vmem:[%s1313_s1 + $0x40] sm:$0xff]   ;;  %v998_v2 = vld [vmem:[%s1313_s1 + $0x48] sm:$0xff]   ;;  %v1000_v4 = vld [vmem:[%s1313_s1 + $0x50] sm:$0xff]  }
   0x2   :  { %v997_v1 = vld [vmem:[%s1313_s1] sm:$0xff]   ;;  %888 = vmatprep.subr.bf16.mxu0 %v996_v0  ;;  %v999_v3 = vld [vmem:[%s1313_s1 + $0x8] sm:$0xff]   ;;  %v1001_v5 = vld [vmem:[%s1313_s1 + $0x10] sm:$0xff]  }
   0x3   :  { %889 = vmatpush3.bf16.msra.mxu0 %v997_v1  ;;  %v1002_v6 = vld [vmem:[%s1313_s1 + $0x58] sm:$0xff]   ;;  %v1004_v8 = vld [vmem:[%s1313_s1 + $0x60] sm:$0xff]   ;;  %v1006_v10 = vld [vmem:[%s1313_s1 + $0x68] sm:$0xff]  }
   0x4   :  { %890 = vmatprep.subr.bf16.mxu0 %v998_v2  ;;  %v1003_v7 = vld [vmem:[%s1313_s1 + $0x18] sm:$0xff]   ;;  %v1005_v9 = vld [vmem:[%s1313_s1 + $0x20] sm:$0xff]   ;;  %v1007_v11 = vld [vmem:[%s1313_s1 + $0x28] sm:$0xff]  }
   0x5   :  { %v1014_v12 = vld [vmem:[%s1312_s0 + $0x4] ss:$8 sps:$4 sm:$0xff]   ;;  %v1008_v13 = vld [vmem:[%s1313_s1 + $0x70] sm:$0xff]  }
   0x6   :  { %229 = vmatprep.mubr.bf16.mxu0 %v1014_v12  ;;  %v1009_v14 = vld [vmem:[%s1313_s1 + $0x30] sm:$0xff]  }
   0x7   :  { %891 = vmatpush3.bf16.msra.mxu0 %v999_v3 }
   0x8   :  { %892 = vmatprep.subr.bf16.mxu0 %v1000_v4 }
   0xb   :  { %893 = vmatpush3.bf16.msra.mxu0 %v1001_v5 }
   0xc   :  { %894 = vmatprep.subr.bf16.mxu0 %v1002_v6 }
   0xf   :  { %895 = vmatpush3.bf16.msra.mxu0 %v1003_v7 }
  0x10   :  { %896 = vmatprep.subr.bf16.mxu0 %v1004_v8 }
  0x13   :  { %897 = vmatpush3.bf16.msra.mxu0 %v1005_v9 }
  0x14   :  { %898 = vmatprep.subr.bf16.mxu0 %v1006_v10 }
  0x17   :  { %899 = vmatpush3.bf16.msra.mxu0 %v1007_v11 }
  0x18   :  { %10 = vsyncpa [#allocation3], 0  ;;  %900 = vmatprep.subr.bf16.mxu0 %v1008_v13  ;;  %v1010_v15 = vld [vmem:[%s1313_s1 + $0x78] sm:$0xff]   ;;  %v1012_v17 = vld [vmem:[%s1312_s0] ss:$8 sps:$4 sm:$0xff]   ;;  %v1068_v19 = vmov 0.0  }
  0x19   :  { %v1011_v16 = vld [vmem:[%s1313_s1 + $0x38] sm:$0xff]   ;;  %v1015_v18 = vld [vmem:[%s1314_s2] sm:$0xff]   ;;  %933 = vmatprep.subr.bf16.mxu1 %v1068_v19  ;;  %v1016_v20 = vld [vmem:[%s1314_s2 + $0x8] sm:$0xff]   ;;  %vm1069_vm0 = vmmov 0   ;;  %vm255_vm1 = vcmask 261120   ;;  %s1070_s8 = smov 96  }
  0x1a   :  { %934 = vmatpush3.bf16.msra.mxu1 %v1015_v18  ;;  %937 = vmatprep.mubr.msk.bf16.mxu1 %vm1069_vm0, %v1068_v19  ;;  %v842_v25 = vld [vmem:[%s1316_s4] ss:$0 sm:$0xff]  ;;  %v1190_v32 = vld [vmem:[%s1315_s3 + $0x8] sm:$0xff]   ;;  %v1197_v33 = vld [vmem:[%s1315_s3 + $0x10] sm:$0xff]   ;;  %vm300_vm2 = vcmask 523264   ;;  %s1071_s24 = smov 112  }
  0x1b   :  { %901 = vmatpush3.bf16.msra.mxu0 %v1009_v14  ;;  %935 = vmatprep.subr.bf16.mxu1 %v1068_v19  ;;  %v1181_v31 = vld [vmem:[%s1315_s3] sm:$0xff]   ;;  %v1204_v34 = vld [vmem:[%s1315_s3 + $0x18] sm:$0xff]   ;;  %vm442_vm3 = vcmask 130048   ;;  %vm826_vm4 = vcmask 0  }
  0x1c   :  { %902 = vmatprep.subr.bf16.mxu0 %v1010_v15  ;;  %v861_v35 = vld [vmem:[%s1316_s4 + $0x1] ss:$0 sm:$0xff]  ;;  %728 = vrot.lane.b32.xlu1 %v1181_v31, %s1071_s24 }
  0x1e   :  { %936 = vmatpush3.bf16.msra.mxu1 %v1016_v20 }
  0x1f   :  { %903 = vmatpush3.bf16.msra.mxu0 %v1011_v16  ;;  %941 = vmatprep.subr.bf16.mxu1 %v1068_v19 }
  0x20   :  { %959 = vmatprep.subr.bf16.mxu0 %v1068_v19  ;;  %550 = vrot.lane.b32.xlu1 %v1190_v32, %s1070_s8 }
  0x22   :  { %230 = vmatmul.mubr.bf16.vlgmr.msra.gmra.mrb[0].mxu0 %v1012_v17  ;;  %v865_v17 = vld [vmem:[%s1316_s4 + $0x2] ss:$0 sm:$0xff] }
  0x23   :  { %967 = vmatprep.mubr.msk.bf16.mxu0 %vm1069_vm0, %v1068_v19 }
  0x24   :  { %552 = vrot.lane.b32.xlu1 %v1197_v33, %s1070_s8 }
  0x28   :  { %554 = vrot.lane.b32.xlu1 %v1204_v34, %s1070_s8 }
  0xf5   :  { %v904_v21 = vpop.f32.mrb[0].mxu0 }
  0xf6   :  { %v905_v22 = vpop.f32.mrb[1].mxu0 }
  0xf7   :  { %v906_v23 = vadd.f32 %v905_v22, %v904_v21  ;;  %v907_v24 = vpop.f32.mrb[2].mxu0  ;;  %v866_v21 = vld [vmem:[%s1316_s4 + $0x3] ss:$0 sm:$0xff] }
  0xf8   :  { %v908_v26 = vpop.f32.mrb[3].mxu0 }
  0xf9   :  { %v909_v27 = vadd.f32 %v908_v26, %v907_v24  ;;  %v232_v28 = vadd.f32 %v906_v23, %v842_v25 }
  0xfb   :  { %v235_v29 = vadd.f32 %v909_v27, %v842_v25 }
  0xfd   :  { %v238_v30 = vpack.c.bf16 %v235_v29, %v232_v28  ;;  %v1021_v29 = vld [vmem:[%s1314_s2 + $0x20] sm:$0xff]  }
  0xff   :  { %609 = vrot.lane.b32.xlu0 %v238_v30, %s1070_s8  ;;  %938 = vmatmul.mubr.msk.bf16.vlgmr.msra.gmra.mrb[0].mxu1 %vm255_vm1, %v238_v30 }
 0x100   :  { %949 = vmatprep.mubr.msk.bf16.mxu1 %vm1069_vm0, %v1068_v19  ;;  %942 = vmatpush3.bf16.msra.mxu1 %v1181_v31 }
 0x101   :  { %943 = vmatprep.subr.bf16.mxu1 %v1068_v19 }
 0x103   :  { %548 = vrot.lane.b32.xlu0 %v1181_v31, %s1070_s8 }
 0x104   :  { %944 = vmatpush3.bf16.msra.mxu1 %v1190_v32 }
 0x105   :  { %945 = vmatprep.subr.bf16.mxu1 %v1068_v19 }
 0x107   :  { %730 = vrot.lane.b32.xlu0 %v1190_v32, %s1071_s24 }
 0x108   :  { %946 = vmatpush3.bf16.msra.mxu1 %v1197_v33 }
 0x109   :  { %947 = vmatprep.subr.bf16.mxu1 %v1068_v19 }
 0x10b   :  { %732 = vrot.lane.b32.xlu0 %v1197_v33, %s1071_s24  ;;  %v1022_v33 = vld [vmem:[%s1314_s2 + $0x10] sm:$0xff]  }
 0x10c   :  { %948 = vmatpush3.bf16.msra.mxu1 %v1204_v34 }
 0x10d   :  { %953 = vmatprep.subr.bf16.mxu1 %v1068_v19 }
 0x10f   :  { %734 = vrot.lane.b32.xlu0 %v1204_v34, %s1071_s24  ;;  %v1023_v34 = vld [vmem:[%s1314_s2 + $0x18] sm:$0xff]  }
 0x1d2   :  { %v293_v36 = vpop.f32.mrb[0].mxu1 }
 0x1d3   :  { %v294_v37 = vadd.f32 %v861_v35, %v293_v36  ;;  %v939_v38 = vpop.f32.mrb[1].mxu1 }
 0x1d4   :  { %v296_v39 = vpop.f32.mrb[2].mxu1 }
 0x1d5   :  { %v301_v40 = vsel %vm300_vm2, %v294_v37, 0.0  ;;  %v297_v41 = vadd.f32 %v861_v35, %v296_v39  ;;  %v940_v42 = vpop.f32.mrb[3].mxu1  ;;  %v867_v35 = vld [vmem:[%s1316_s4 + $0x4] ss:$0 sm:$0xff] }
 0x1d6   :  { %v302_v43 = vrot.slane %v301_v40, 4  ;;  %v729_v42 = vpop.permute.xlu1 %728 }
 0x1d7   :  { %v334_v44 = vsel %vm300_vm2, %v297_v41, 0.0 }
 0x1d8   :  { %v303_v45 = vadd.f32 %v302_v43, %v301_v40  ;;  %v335_v46 = vrot.slane %v334_v44, 4 }
 0x1da   :  { %v304_v47 = vrot.slane %v303_v45, 2  ;;  %v336_v48 = vadd.f32 %v335_v46, %v334_v44  ;;  %v551_v44 = vpop.permute.xlu1 %550 }
 0x1dc   :  { %v305_v49 = vadd.f32 %v304_v47, %v303_v45  ;;  %v337_v50 = vrot.slane %v336_v48, 2 }
 0x1de   :  { %v306_v51 = vrot.slane %v305_v49, 1  ;;  %v338_v52 = vadd.f32 %v337_v50, %v336_v48  ;;  %v553_v45 = vpop.permute.xlu1 %552  ;;  %v873_v50 = vld [vmem:[%s1316_s4 + $0x9] ss:$0 sm:$0xff] }
 0x1e0   :  { %v307_v53 = vadd.f32 %v306_v51, %v305_v49  ;;  %v339_v54 = vrot.slane %v338_v52, 1 }
 0x1e2   :  { %v309_v55 = vmul.f32 0.125, %v307_v53  ;;  %v340_v56 = vadd.f32 %v339_v54, %v338_v52  ;;  %v555_v46 = vpop.permute.xlu1 %554 }
 0x1e4   :  { %v310_v57 = vsub.f32 %v294_v37, %v309_v55  ;;  %v341_v58 = vmul.f32 0.125, %v340_v56 }
 0x1e6   :  { %v311_v59 = vmul.f32 %v310_v57, %v310_v57  ;;  %v342_v60 = vsub.f32 %v297_v41, %v341_v58  ;;  %v610_v41 = vpop.permute.xlu0 %609 }
 0x1e8   :  { %v312_v61 = vsel %vm300_vm2, %v311_v59, 0.0  ;;  %v343_v62 = vmul.f32 %v342_v60, %v342_v60 }
 0x1e9   :  { %v313_v63 = vrot.slane %v312_v61, 4 }
 0x1ea   :  { %v344_v0 = vsel %vm300_vm2, %v343_v62, 0.0  ;;  %v549_v43 = vpop.permute.xlu0 %548 }
 0x1eb   :  { %v314_v1 = vadd.f32 %v313_v63, %v312_v61  ;;  %v345_v2 = vrot.slane %v344_v0, 4  ;;  %960 = vmatpush3.bf16.msra.mxu0 %v549_v43 }
 0x1ec   :  { %961 = vmatprep.subr.bf16.mxu0 %v1068_v19 }
 0x1ed   :  { %v315_v3 = vrot.slane %v314_v1, 2  ;;  %v346_v4 = vadd.f32 %v345_v2, %v344_v0 }
 0x1ee   :  { %v731_v47 = vpop.permute.xlu0 %730 }
 0x1ef   :  { %v316_v5 = vadd.f32 %v315_v3, %v314_v1  ;;  %v347_v6 = vrot.slane %v346_v4, 2  ;;  %962 = vmatpush3.bf16.msra.mxu0 %v551_v44 }
 0x1f0   :  { %963 = vmatprep.subr.bf16.mxu0 %v1068_v19 }
 0x1f1   :  { %v317_v7 = vrot.slane %v316_v5, 1  ;;  %v348_v8 = vadd.f32 %v347_v6, %v346_v4 }
 0x1f2   :  { %v733_v48 = vpop.permute.xlu0 %732 }
 0x1f3   :  { %v318_v9 = vadd.f32 %v317_v7, %v316_v5  ;;  %v349_v10 = vrot.slane %v348_v8, 1  ;;  %964 = vmatpush3.bf16.msra.mxu0 %v553_v45 }
 0x1f4   :  { %965 = vmatprep.subr.bf16.mxu0 %v1068_v19 }
 0x1f5   :  { %v319_v11 = vmul.f32 0.125, %v318_v9  ;;  %v350_v12 = vadd.f32 %v349_v10, %v348_v8 }
 0x1f6   :  { %v735_v49 = vpop.permute.xlu0 %734 }
 0x1f7   :  { %v320_v13 = vadd.f32 1e-05, %v319_v11  ;;  %v351_v14 = vmul.f32 0.125, %v350_v12  ;;  %966 = vmatpush3.bf16.msra.mxu0 %v555_v46 }
 0x1f9   :  { %1024 = vrsqrt.f32 %v320_v13  ;;  %v352_v15 = vadd.f32 1e-05, %v351_v14 }
 0x1fb   :  { %1026 = vrsqrt.f32 %v352_v15 }
 0x203   :  { %v1025_v16 = vpop.eup %1024 }
 0x204   :  { %v322_v18 = vmul.f32 %v1025_v16, %v310_v57 }
 0x205   :  { %v1027_v20 = vpop.eup %1026 }
 0x206   :  { %v327_v22 = vmul.f32 %v865_v17, %v322_v18  ;;  %v354_v23 = vmul.f32 %v1027_v20, %v342_v60 }
 0x208   :  { %v332_v24 = vadd.f32 %v866_v21, %v327_v22  ;;  %v355_v25 = vmul.f32 %v865_v17, %v354_v23 }
 0x20a   :  { %v356_v26 = vadd.f32 %v866_v21, %v355_v25  ;;  %v333_v27 = vmax.f32 %v332_v24, 0.0 }
 0x20c   :  { %v357_v28 = vmax.f32 %v356_v26, 0.0 }
 0x20e   :  { %v358_v30 = vpack.c.bf16 %v357_v28, %v333_v27 }
 0x210   :  { %950 = vmatmul.mubr.msk.bf16.vlgmr.msra.gmra.mrb[4].mxu1 %vm300_vm2, %v358_v30 }
 0x211   :  { %954 = vmatpush3.bf16.msra.mxu1 %v1021_v29  ;;  %955 = vmatprep.mubr.msk.bf16.mxu1 %vm1069_vm0, %v1068_v19 }
 0x212   :  { %971 = vmatprep.subr.bf16.mxu1 %v1068_v19 }
 0x2e3   :  { %v424_v31 = vpop.f32.mrb[4].mxu1 }
 0x2e4   :  { %v951_v36 = vpop.f32.mrb[5].mxu1  ;;  %v425_v38 = vadd.f32 %v867_v35, %v424_v31 }
 0x2e5   :  { %v427_v37 = vpop.f32.mrb[6].mxu1 }
 0x2e6   :  { %v428_v39 = vadd.f32 %v867_v35, %v427_v37  ;;  %v952_v32 = vpop.f32.mrb[7].mxu1 }
 0x2e8   :  { %v431_v40 = vpack.c.bf16 %v428_v39, %v425_v38 }
 0x2ea   :  { %956 = vmatmul.mubr.msk.bf16.vlgmr.msra.gmra.mrb[8].mxu1 %vm442_vm3, %v431_v40 }
 0x2eb   :  { %972 = vmatpush3.bf16.msra.mxu1 %v1022_v33  ;;  %975 = vmatprep.mubr.msk.bf16.mxu1 %vm1069_vm0, %v1068_v19 }
 0x2ec   :  { %973 = vmatprep.subr.bf16.mxu1 %v1068_v19 }
 0x2ef   :  { %974 = vmatpush3.bf16.msra.mxu1 %v1023_v34 }
 0x2f0   :  { %979 = vmatprep.subr.bf16.mxu1 %v1068_v19 }
 0x2f2   :  { %976 = vmatmul.mubr.msk.bf16.vlgmr.msra.gmra.mrb[12].mxu1 %vm255_vm1, %v610_v41 }
 0x2f3   :  { %987 = vmatprep.mubr.msk.bf16.mxu1 %vm1069_vm0, %v1068_v19  ;;  %980 = vmatpush3.bf16.msra.mxu1 %v729_v42 }
 0x2f4   :  { %981 = vmatprep.subr.bf16.mxu1 %v1068_v19 }
 0x2f7   :  { %982 = vmatpush3.bf16.msra.mxu1 %v731_v47 }
 0x2f8   :  { %983 = vmatprep.subr.bf16.mxu1 %v1068_v19 }
 0x2fb   :  { %984 = vmatpush3.bf16.msra.mxu1 %v733_v48 }
 0x2fc   :  { %985 = vmatprep.subr.bf16.mxu1 %v1068_v19  ;;  %v880_v19 = vld [vmem:[%s1316_s4 + $0x5] ss:$0 sm:$0xff] }
 0x2ff   :  { %986 = vmatpush3.bf16.msra.mxu1 %v735_v49 }
 0x3bd   :  { %v480_v51 = vpop.f32.mrb[8].mxu1 }
 0x3be   :  { %v481_v52 = vadd.f32 %v873_v50, %v480_v51  ;;  %v957_v53 = vpop.f32.mrb[9].mxu1 }
 0x3bf   :  { %v483_v54 = vpop.f32.mrb[10].mxu1 }
 0x3c0   :  { %v487_v55 = vsel %vm300_vm2, %v481_v52, 0.0  ;;  %v484_v56 = vadd.f32 %v873_v50, %v483_v54  ;;  %v958_v57 = vpop.f32.mrb[11].mxu1 }
 0x3c1   :  { %v488_v58 = vrot.slane %v487_v55, 4 }
 0x3c2   :  { %v519_v59 = vsel %vm300_vm2, %v484_v56, 0.0 }
 0x3c3   :  { %v489_v60 = vadd.f32 %v488_v58, %v487_v55  ;;  %v520_v61 = vrot.slane %v519_v59, 4 }
 0x3c5   :  { %v490_v62 = vrot.slane %v489_v60, 2  ;;  %v521_v63 = vadd.f32 %v520_v61, %v519_v59  ;;  %v660_v0 = vpop.f32.mrb[12].mxu1 }
 0x3c6   :  { %v661_v1 = vadd.f32 %v880_v19, %v660_v0  ;;  %v977_v2 = vpop.f32.mrb[13].mxu1 }
 0x3c7   :  { %v491_v3 = vadd.f32 %v490_v62, %v489_v60  ;;  %v522_v4 = vrot.slane %v521_v63, 2  ;;  %v663_v5 = vpop.f32.mrb[14].mxu1 }
 0x3c8   :  { %v667_v6 = vsel %vm300_vm2, %v661_v1, 0.0  ;;  %v664_v7 = vadd.f32 %v880_v19, %v663_v5  ;;  %v978_v8 = vpop.f32.mrb[15].mxu1 }
 0x3c9   :  { %v492_v9 = vrot.slane %v491_v3, 1  ;;  %v523_v10 = vadd.f32 %v522_v4, %v521_v63  ;;  %v668_v11 = vrot.slane %v667_v6, 4 }
 0x3ca   :  { %v699_v12 = vsel %vm300_vm2, %v664_v7, 0.0 }
 0x3cb   :  { %v493_v13 = vadd.f32 %v492_v9, %v491_v3  ;;  %v524_v14 = vrot.slane %v523_v10, 1  ;;  %v669_v15 = vadd.f32 %v668_v11, %v667_v6  ;;  %v700_v16 = vrot.slane %v699_v12, 4 }
 0x3cd   :  { %v494_v17 = vmul.f32 0.125, %v493_v13  ;;  %v525_v18 = vadd.f32 %v524_v14, %v523_v10  ;;  %v670_v20 = vrot.slane %v669_v15, 2  ;;  %v701_v21 = vadd.f32 %v700_v16, %v699_v12  ;;  %v876_v12 = vld [vmem:[%s1316_s4 + $0xa] ss:$0 sm:$0xff] }
 0x3cf   :  { %v495_v22 = vsub.f32 %v481_v52, %v494_v17  ;;  %v526_v23 = vmul.f32 0.125, %v525_v18  ;;  %v671_v24 = vadd.f32 %v670_v20, %v669_v15  ;;  %v702_v25 = vrot.slane %v701_v21, 2  ;;  %v877_v15 = vld [vmem:[%s1316_s4 + $0xb] ss:$0 sm:$0xff] }
 0x3d1   :  { %v496_v26 = vmul.f32 %v495_v22, %v495_v22  ;;  %v527_v27 = vsub.f32 %v484_v56, %v526_v23  ;;  %v672_v28 = vrot.slane %v671_v24, 1  ;;  %v703_v29 = vadd.f32 %v702_v25, %v701_v21 }
 0x3d3   :  { %v497_v30 = vsel %vm300_vm2, %v496_v26, 0.0  ;;  %v528_v35 = vmul.f32 %v527_v27, %v527_v27  ;;  %v673_v31 = vadd.f32 %v672_v28, %v671_v24  ;;  %v704_v36 = vrot.slane %v703_v29, 1  ;;  %v884_v24 = vld [vmem:[%s1316_s4 + $0x6] ss:$0 sm:$0xff] }
 0x3d4   :  { %v498_v37 = vrot.slane %v497_v30, 4 }
 0x3d5   :  { %v529_v38 = vsel %vm300_vm2, %v528_v35, 0.0  ;;  %v674_v39 = vmul.f32 0.125, %v673_v31  ;;  %v705_v32 = vadd.f32 %v704_v36, %v703_v29 }
 0x3d6   :  { %v499_v33 = vadd.f32 %v498_v37, %v497_v30  ;;  %v530_v40 = vrot.slane %v529_v38, 4 }
 0x3d7   :  { %v675_v34 = vsub.f32 %v661_v1, %v674_v39  ;;  %v706_v41 = vmul.f32 0.125, %v705_v32 }
 0x3d8   :  { %v500_v42 = vrot.slane %v499_v33, 2  ;;  %v531_v43 = vadd.f32 %v530_v40, %v529_v38 }
 0x3d9   :  { %v676_v44 = vmul.f32 %v675_v34, %v675_v34  ;;  %v707_v45 = vsub.f32 %v664_v7, %v706_v41 }
 0x3da   :  { %v501_v46 = vadd.f32 %v500_v42, %v499_v33  ;;  %v532_v47 = vrot.slane %v531_v43, 2  ;;  %v878_v33 = vld [vmem:[%s1316_s4 + $0xc] ss:$0 sm:$0xff] }
 0x3db   :  { %v677_v48 = vsel %vm300_vm2, %v676_v44, 0.0  ;;  %v708_v49 = vmul.f32 %v707_v45, %v707_v45 }
 0x3dc   :  { %v502_v50 = vrot.slane %v501_v46, 1  ;;  %v533_v51 = vadd.f32 %v532_v47, %v531_v43  ;;  %v678_v52 = vrot.slane %v677_v48, 4 }
 0x3dd   :  { %v709_v53 = vsel %vm300_vm2, %v708_v49, 0.0 }
 0x3de   :  { %v503_v54 = vadd.f32 %v502_v50, %v501_v46  ;;  %v534_v55 = vrot.slane %v533_v51, 1  ;;  %v679_v56 = vadd.f32 %v678_v52, %v677_v48  ;;  %v710_v57 = vrot.slane %v709_v53, 4  ;;  %v886_v48 = vld [vmem:[%s1316_s4 + $0x8] ss:$0 sm:$0xff] }
 0x3e0   :  { %v504_v58 = vmul.f32 0.125, %v503_v54  ;;  %v535_v59 = vadd.f32 %v534_v55, %v533_v51  ;;  %v680_v60 = vrot.slane %v679_v56, 2  ;;  %v711_v61 = vadd.f32 %v710_v57, %v709_v53 }
 0x3e2   :  { %v505_v19 = vadd.f32 1e-05, %v504_v58  ;;  %v536_v62 = vmul.f32 0.125, %v535_v59  ;;  %v681_v63 = vadd.f32 %v680_v60, %v679_v56  ;;  %v712_v0 = vrot.slane %v711_v61, 2 }
 0x3e4   :  { %1028 = vrsqrt.f32 %v505_v19  ;;  %v537_v1 = vadd.f32 1e-05, %v536_v62  ;;  %v682_v2 = vrot.slane %v681_v63, 1  ;;  %v713_v3 = vadd.f32 %v712_v0, %v711_v61 }
 0x3e6   :  { %1030 = vrsqrt.f32 %v537_v1  ;;  %v683_v4 = vadd.f32 %v682_v2, %v681_v63  ;;  %v714_v5 = vrot.slane %v713_v3, 1 }
 0x3e8   :  { %v684_v6 = vmul.f32 0.125, %v683_v4  ;;  %v715_v7 = vadd.f32 %v714_v5, %v713_v3 }
 0x3ea   :  { %v685_v8 = vadd.f32 1e-05, %v684_v6  ;;  %v716_v9 = vmul.f32 0.125, %v715_v7 }
 0x3ec   :  { %1032 = vrsqrt.f32 %v685_v8  ;;  %v717_v10 = vadd.f32 1e-05, %v716_v9 }
 0x3ee   :  { %v1029_v11 = vpop.eup %1028  ;;  %1034 = vrsqrt.f32 %v717_v10 }
 0x3ef   :  { %v507_v13 = vmul.f32 %v1029_v11, %v495_v22  ;;  %v885_v22 = vld [vmem:[%s1316_s4 + $0x7] ss:$0 sm:$0xff]  ;;  %s1072_s4 = smov [#allocation2]  }
 0x3f0   :  { %v1031_v14 = vpop.eup %1030  ;;  %s834_s3 = sshll.u32 %s1072_s4, 4  ;;  %s835_s3 = int_to_ptr.vmem [resolvable:$true] %s834_s3 }
 0x3f1   :  { %v512_v16 = vmul.f32 %v876_v12, %v507_v13  ;;  %v539_v17 = vmul.f32 %v1031_v14, %v527_v27  ;;  %s1044_s19 = scalar_lea.vmem %s835_s3, 16  ;;  %s1048_s20 = scalar_lea.vmem %s835_s3, 32 }
 0x3f2   :  { %p1045_p0 = scmp.ne.s32.totalorder %s835_s3, %s1044_s19  ;;  %p1049_p1 = scmp.lt.s32.totalorder %s835_s3, %s835_s3 }
 0x3f3   :  { %v517_v18 = vadd.f32 %v877_v15, %v512_v16  ;;  %v540_v20 = vmul.f32 %v876_v12, %v539_v17  ;;  %p1050_p2 = scmp.lt.s32.totalorder %s1048_s20, %s1044_s19 }
 0x3f5   :  { %v541_v21 = vadd.f32 %v877_v15, %v540_v20  ;;  %v518_v25 = vmax.f32 %v517_v18, 0.0  ;;  %p1051_p3 = por %p1050_p2, %p1049_p1 }
 0x3f6   :  { %v1033_v23 = vpop.eup %1032 }
 0x3f7   :  { %v542_v26 = vmax.f32 %v541_v21, 0.0  ;;  %v687_v28 = vmul.f32 %v1033_v23, %v675_v34  ;;  %p1052_p4 = pnand %p1051_p3, %p1045_p0 }
 0x3f8   :  { %v1035_v29 = vpop.eup %1034 }
 0x3f9   :  { %v543_v30 = vpack.c.bf16 %v542_v26, %v518_v25  ;;  %v692_v35 = vmul.f32 %v884_v24, %v687_v28  ;;  %v719_v31 = vmul.f32 %v1035_v29, %v707_v45 }
 0x3fb   :  { %v697_v27 = vadd.f32 %v885_v22, %v692_v35  ;;  %v720_v36 = vmul.f32 %v884_v24, %v719_v31  ;;  %968 = vmatmul.mubr.msk.bf16.vlgmr.msra.gmra.mrb[4].mxu0 %vm300_vm2, %v543_v30 }
 0x3fd   :  { %v721_v37 = vadd.f32 %v885_v22, %v720_v36  ;;  %v698_v38 = vmax.f32 %v697_v27, 0.0 }
 0x3ff   :  { %v722_v39 = vmax.f32 %v721_v37, 0.0 }
 0x401   :  { %v723_v32 = vpack.c.bf16 %v722_v39, %v698_v38 }
 0x403   :  { %988 = vmatmul.mubr.msk.bf16.vlgmr.msra.gmra.mrb[16].mxu1 %vm300_vm2, %v723_v32 }
 0x4ce   :  { %v597_v40 = vpop.f32.mrb[4].mxu0 }
 0x4cf   :  { %v598_v34 = vadd.f32 %v878_v33, %v597_v40  ;;  %v969_v41 = vpop.f32.mrb[5].mxu0 }
 0x4d0   :  { %v600_v42 = vpop.f32.mrb[6].mxu0 }
 0x4d1   :  { %v601_v43 = vadd.f32 %v878_v33, %v600_v42  ;;  %v970_v44 = vpop.f32.mrb[7].mxu0  ;;  %v784_v45 = vmul.f32 %v598_v34, %v598_v34 }
 0x4d3   :  { %v786_v46 = vsel %vm442_vm3, %v784_v45, 0.0  ;;  %v785_v47 = vmul.f32 %v601_v43, %v601_v43 }
 0x4d4   :  { %787 = vadd.xlane.f32.xlu1 %v786_v46 }
 0x4d5   :  { %v789_v49 = vsel %vm442_vm3, %v785_v47, 0.0 }
 0x4d6   :  { %790 = vadd.xlane.f32.xlu0 %v789_v49  ;;  %v777_v50 = vpop.f32.mrb[16].mxu1 }
 0x4d7   :  { %v778_v51 = vadd.f32 %v886_v48, %v777_v50  ;;  %v989_v52 = vpop.f32.mrb[17].mxu1 }
 0x4d8   :  { %v780_v53 = vpop.f32.mrb[18].mxu1 }
 0x4d9   :  { %v781_v54 = vadd.f32 %v886_v48, %v780_v53  ;;  %v990_v55 = vpop.f32.mrb[19].mxu1  ;;  %v798_v56 = vmul.f32 %v778_v51, %v778_v51 }
 0x4db   :  { %v800_v57 = vsel %vm442_vm3, %v798_v56, 0.0  ;;  %v799_v58 = vmul.f32 %v781_v54, %v781_v54 }
 0x4dc   :  { %801 = vadd.xlane.f32.xlu0 %v800_v57 }
 0x4dd   :  { %v803_v59 = vsel %vm442_vm3, %v799_v58, 0.0 }
 0x4de   :  { %804 = vadd.xlane.f32.xlu1 %v803_v59 }
 0x561   :  { %v788_v60 = vpop.xlane.xlu1 %787 }
 0x562   :  { %v792_v19 = vmax.f32 %v788_v60, 1e-24 }
 0x563   :  { %v791_v61 = vpop.xlane.xlu0 %790 }
 0x564   :  { %v793_v62 = vmax.f32 %v791_v61, 1e-24  ;;  %1036 = vrsqrt.f32 %v792_v19 }
 0x566   :  { %1038 = vrsqrt.f32 %v793_v62 }
 0x569   :  { %v802_v63 = vpop.xlane.xlu0 %801 }
 0x56a   :  { %v806_v0 = vmax.f32 %v802_v63, 1e-24 }
 0x56b   :  { %v805_v1 = vpop.xlane.xlu1 %804 }
 0x56c   :  { %1040 = vrsqrt.f32 %v806_v0  ;;  %v807_v2 = vmax.f32 %v805_v1, 1e-24 }
 0x56e   :  { %1042 = vrsqrt.f32 %v807_v2  ;;  %v1037_v3 = vpop.eup %1036 }
 0x56f   :  { %v796_v8 = vmul.f32 %v1037_v3, %v598_v34 }
 0x570   :  { %v1039_v4 = vpop.eup %1038 }
 0x571   :  { %v797_v9 = vmul.f32 %v1039_v4, %v601_v43 }
 0x576   :  { %v1041_v5 = vpop.eup %1040 }
 0x577   :  { %v810_v6 = vmul.f32 %v1041_v5, %v778_v51 }
 0x578   :  { %v1043_v7 = vpop.eup %1042 }
 0x579   :  { %v811_v10 = vmul.f32 %v1043_v7, %v781_v54  ;;  %v813_v12 = vmul.f32 %v810_v6, %v797_v9 }
 0x57b   :  { %v812_v11 = vmul.f32 %v811_v10, %v796_v8 }
 0x57d   :  { %v814_v13 = vadd.f32 %v813_v12, %v812_v11 }
 0x57f   :  { %v815_v14 = vsel %vm442_vm3, %v814_v13, 0.0 }
 0x580   :  { %816 = vadd.xlane.f32.xlu0 %v815_v14 }
 0x60d   :  { %v817_v15 = vpop.xlane.xlu0 %816 }
 0x60e   :  { %v818_v16 = vrot.slane %v817_v15, 4 }
 0x610   :  { %v819_v17 = vadd.f32 %v818_v16, %v817_v15 }
 0x612   :  { %v820_v18 = vrot.slane %v819_v17, 2 }
 0x614   :  { %v821_v20 = vadd.f32 %v820_v18, %v819_v17 }
 0x616   :  { %v822_v21 = vrot.slane %v821_v20, 1 }
 0x618   :  { %v823_v23 = vadd.f32 %v822_v21, %v821_v20 }
 0x61a   :  { %v824_v24 = vsub.f32 0.0, %v823_v23 }
 0x61c   :  { %v825_v25 = vmul.f32 0.0625, %v824_v24 }
 0x61e   :  { %827 = vst.msk [vmem:[#allocation2] sm:$0x1] %vm826_vm4, %v825_v25 }
 0x61f   :  { %1055 = shalt.err (!%p1052_p4)
}
 0x620   :  { %s1056_s23 = scalar_lea.hbm %s1317_s5, 16 }
 0x621   :  { %p1057_p5 = scmp.ne.s32.totalorder %s1317_s5, %s1056_s23  ;;  %p1060_p6 = scmp.lt.u32.totalorder %s1056_s23, %s1317_s5 }
 0x623   :  { %p1062_p7 = pnand %p1060_p6, %p1057_p5 }
 0x625   :  { %1065 = shalt.err (!%p1062_p7)
}
 0x626   :  { %837 = dma.vmem_to_hbm [thread:$0]  %s835_s3, 16, %s1317_s5, [#allocation3]  }
 0x627   :  { %1066 = dma.done.wait [#allocation3], 16  }
 0x628   :  { %1067 = vsyncadd [#allocation3], 4294967280 }
 0x629   :  { %841 = vsyncpa [#allocation3], 1 }

</bundles_post_ra>
